<compile_context>
chip_gen: v5e
topology: v5e:2x2
jax: 0.10.0
libtpu: 0.0.40
codegen_flags: <defaults>
</compile_context>

<pallas_src>
import functools

import jax
import jax.numpy as jnp
from jax.experimental import pallas as pl
from jax.experimental.pallas import tpu as pltpu


# ----------------------------------------------------------------------------
# helpers
# ----------------------------------------------------------------------------

def _round_up(n, m):
    return ((n + m - 1) // m) * m


def _softplus(z):
    # numerically stable softplus (exp/log go to the EUP slot)
    return jnp.maximum(z, 0.0) + jnp.log(1.0 + jnp.exp(-jnp.abs(z)))


def _flatten_pad(img, d_pad, b_pad, dtype):
    """NCHW -> (b_pad, d_pad) row-major flatten, zero-padded, cast to `dtype`."""
    b = img.shape[0]
    x = img.reshape(b, -1).astype(jnp.float32)
    d = x.shape[1]
    x = jnp.pad(x, ((0, b_pad - b), (0, d_pad - d)))
    return x.astype(dtype)


# ----------------------------------------------------------------------------
# fused Pallas kernels
# ----------------------------------------------------------------------------

def _g_fused_kernel(x_ref, w1_ref, b1_ref, w2_ref, b2_ref, out_ref, acc_ref,
                    *, valid_b, loss_kind):
    """Fused discriminator forward + generator loss over a K grid."""
    k = pl.program_id(0)

    @pl.when(k == 0)
    def _():
        acc_ref[...] = jnp.zeros_like(acc_ref)

    # bf16 MXU matmul, f32 accumulation in VMEM scratch
    acc_ref[...] += jnp.dot(x_ref[...], w1_ref[...],
                            preferred_element_type=jnp.float32)

    @pl.when(k == pl.num_programs(0) - 1)
    def _():
        h = acc_ref[...] + b1_ref[...]                  # (TM, H) f32
        a = jnp.where(h > 0, h, 0.2 * h)                # leaky relu 0.2
        # second layer: (H,1) matmul replaced by VPU mul + lane reduce
        logits = jnp.sum(a * w2_ref[...], axis=-1, keepdims=True) + b2_ref[0]
        rows = jax.lax.broadcasted_iota(jnp.int32, logits.shape, 0)
        valid = rows < valid_b
        if loss_kind == 'logistic':
            per = _softplus(-logits)
        else:  # hinge, mode 'g'
            per = -logits
        out_ref[0] = jnp.sum(jnp.where(valid, per, 0.0)) * (1.0 / valid_b)


def _d_fused_kernel(xr_ref, xf_ref, w1_ref, b1_ref, w2_ref, b2_ref,
                    out_ref, acc_r_ref, acc_f_ref, gram_ref,
                    *, valid_b, loss_kind):
    """Fused real+fake forward + discriminator loss + R1 penalty (Gram form)."""
    k = pl.program_id(0)

    @pl.when(k == 0)
    def _():
        acc_r_ref[...] = jnp.zeros_like(acc_r_ref)
        acc_f_ref[...] = jnp.zeros_like(acc_f_ref)
        gram_ref[...] = jnp.zeros_like(gram_ref)

    w1_blk = w1_ref[...]                                # (TK, H) bf16
    acc_r_ref[...] += jnp.dot(xr_ref[...], w1_blk,
                              preferred_element_type=jnp.float32)
    acc_f_ref[...] += jnp.dot(xf_ref[...], w1_blk,
                              preferred_element_type=jnp.float32)
    # Gram accumulation for R1: M += W1_blk^T @ W1_blk (contract over TK);
    # reuses the W1 block already streamed for the forward — no second W1 read.
    gram_ref[...] += jax.lax.dot_general(
        w1_blk, w1_blk, (((0,), (0,)), ((), ())),
        preferred_element_type=jnp.float32)

    @pl.when(k == pl.num_programs(0) - 1)
    def _():
        b1 = b1_ref[...]
        w2 = w2_ref[...]
        b2 = b2_ref[0]
        h_r = acc_r_ref[...] + b1
        h_f = acc_f_ref[...] + b1
        a_r = jnp.where(h_r > 0, h_r, 0.2 * h_r)
        a_f = jnp.where(h_f > 0, h_f, 0.2 * h_f)
        logits_r = jnp.sum(a_r * w2, axis=-1, keepdims=True) + b2
        logits_f = jnp.sum(a_f * w2, axis=-1, keepdims=True) + b2

        rows = jax.lax.broadcasted_iota(jnp.int32, logits_r.shape, 0)
        valid = rows < valid_b
        inv_b = 1.0 / valid_b

        if loss_kind == 'logistic':
            per = _softplus(logits_f) + _softplus(-logits_r)
        else:  # hinge, mode 'd'
            per = (jnp.maximum(1.0 + logits_f, 0.0)
                   + jnp.maximum(1.0 - logits_r, 0.0))
        disc_loss = jnp.sum(jnp.where(valid, per, 0.0)) * inv_b

        # R1 penalty: grad_x = (lrelu'(h) * w2) @ W1^T  =>  ||grad_x||^2 per
        # sample = rowsum((g @ M) * g) with M = W1^T W1 — no (B, D) intermediate.
        dact = jnp.where(h_r > 0, 1.0, 0.2)             # (TM, H)
        g_hidden = dact * w2                            # (TM, H)
        gm = jnp.dot(g_hidden, gram_ref[...],
                     preferred_element_type=jnp.float32)
        per_sample = jnp.sum(gm * g_hidden, axis=-1, keepdims=True)
        r1 = jnp.sum(jnp.where(valid, per_sample, 0.0)) * inv_b

        out_ref[0] = disc_loss
        out_ref[1] = r1
        out_ref[2] = jnp.sum(jnp.where(valid, logits_r, 0.0)) * inv_b
        out_ref[3] = jnp.sum(jnp.where(valid, logits_f, 0.0)) * inv_b


# ----------------------------------------------------------------------------
# pallas_call wrappers (jit'ed)
# ----------------------------------------------------------------------------

def _gan_forward_g(img_fake, w1_bf, b1, w2_row, b2, *, kind, tk):
    b = img_fake.shape[0]
    d_pad, hidden = w1_bf.shape
    b_pad = max(_round_up(b, 16), 16)                   # bf16 sublane packing
    xf = _flatten_pad(img_fake, d_pad, b_pad, jnp.bfloat16)
    num_k = d_pad // tk
    kernel = functools.partial(_g_fused_kernel, valid_b=b, loss_kind=kind)
    out = pl.pallas_call(
        kernel,
        out_shape=jax.ShapeDtypeStruct((1,), jnp.float32),
        grid_spec=pltpu.PrefetchScalarGridSpec(
            num_scalar_prefetch=0,
            grid=(num_k,),
            in_specs=[
                pl.BlockSpec((b_pad, tk), lambda k: (0, k)),
                pl.BlockSpec((tk, hidden), lambda k: (k, 0)),
                pl.BlockSpec((1, hidden), lambda k: (0, 0)),
                pl.BlockSpec((1, hidden), lambda k: (0, 0)),
                pl.BlockSpec(memory_space=pltpu.MemorySpace.SMEM),
            ],
            out_specs=pl.BlockSpec(memory_space=pltpu.MemorySpace.SMEM),
            scratch_shapes=[pltpu.VMEM((b_pad, hidden), jnp.float32)],
        ),
        compiler_params=pltpu.CompilerParams(
            dimension_semantics=("arbitrary",)),
    )(xf, w1_bf, b1, w2_row, b2)
    return out[0]


def _gan_forward_d(img_real, img_fake, w1_bf, b1, w2_row, b2, *, kind, tk):
    b = img_real.shape[0]
    d_pad, hidden = w1_bf.shape
    b_pad = max(_round_up(b, 16), 16)
    xr = _flatten_pad(img_real, d_pad, b_pad, jnp.bfloat16)
    xf = _flatten_pad(img_fake, d_pad, b_pad, jnp.bfloat16)
    num_k = d_pad // tk
    kernel = functools.partial(_d_fused_kernel, valid_b=b, loss_kind=kind)
    out = pl.pallas_call(
        kernel,
        out_shape=jax.ShapeDtypeStruct((4,), jnp.float32),
        grid_spec=pltpu.PrefetchScalarGridSpec(
            num_scalar_prefetch=0,
            grid=(num_k,),
            in_specs=[
                pl.BlockSpec((b_pad, tk), lambda k: (0, k)),
                pl.BlockSpec((b_pad, tk), lambda k: (0, k)),
                pl.BlockSpec((tk, hidden), lambda k: (k, 0)),
                pl.BlockSpec((1, hidden), lambda k: (0, 0)),
                pl.BlockSpec((1, hidden), lambda k: (0, 0)),
                pl.BlockSpec(memory_space=pltpu.MemorySpace.SMEM),
            ],
            out_specs=pl.BlockSpec(memory_space=pltpu.MemorySpace.SMEM),
            scratch_shapes=[
                pltpu.VMEM((b_pad, hidden), jnp.float32),   # acc real
                pltpu.VMEM((b_pad, hidden), jnp.float32),   # acc fake
                pltpu.VMEM((hidden, hidden), jnp.float32),  # Gram M = W1^T W1
            ],
        ),
        compiler_params=pltpu.CompilerParams(
            dimension_semantics=("arbitrary",)),
    )(xr, xf, w1_bf, b1, w2_row, b2)
    return out[0], out[1], out[2], out[3]


# ----------------------------------------------------------------------------
# GANLoss module equivalent
# ----------------------------------------------------------------------------

class Config:
    def __init__(self, lambda_gan=1.0, lambda_grad=10.0):
        self.lambda_gan = lambda_gan
        self.lambda_grad = lambda_grad


class GANLoss:
    """JAX/Pallas re-implementation of GANLoss.forward (auxillary=False)."""

    def __init__(self, cfg, disc_loss='logistic', auxillary=False,
                 in_channels=3, hidden=128, img_hw=16, seed=1, tk=256):
        assert not auxillary, "auxillary discriminator head not supported"
        self.cfg = cfg
        self.kind = disc_loss
        d = in_channels * img_hw * img_hw
        # K tile: 256 is plenty for the demo; can be raised (<=2048) on
        # v5e/v6e (128 MiB VMEM) and kept <=2048 on v7x (64 MiB VMEM).
        self.tk = min(tk, _round_up(d, 128))
        d_pad = _round_up(d, self.tk)

        k1, k2 = jax.random.split(jax.random.PRNGKey(seed))
        w1 = (jax.random.normal(k1, (d, hidden), jnp.float32)
              * (1.0 / jnp.sqrt(d)))
        w2 = (jax.random.normal(k2, (hidden, 1), jnp.float32)
              * (1.0 / jnp.sqrt(hidden)))
        # Pad W1 along D (zero rows are no-ops for both h and the Gram matrix);
        # store bf16 for the MXU stream. Bias / w2 stay f32 (epilogue math).
        w1 = jnp.pad(w1, ((0, d_pad - d), (0, 0)))
        self.w1_bf16 = w1.astype(jnp.bfloat16)          # (D_pad, H)
        self.b1 = jnp.zeros((1, hidden), jnp.float32)
        self.w2_row = jnp.transpose(w2)                 # (1, H), built once at init
        self.b2 = jnp.zeros((1,), jnp.float32)

        self._g_fn = jax.jit(functools.partial(_gan_forward_g,
                                               kind=self.kind, tk=self.tk))
        self._d_fn = jax.jit(functools.partial(_gan_forward_d,
                                               kind=self.kind, tk=self.tk))

    def forward(self, disc_in_real, disc_in_fake, mode='g', gt_label=None):
        if mode == 'g':
            g_loss = self._g_fn(disc_in_fake, self.w1_bf16, self.b1,
                                self.w2_row, self.b2)
            log = {'loss_train/g_loss': g_loss}          # device scalar, no sync
            return g_loss * self.cfg.lambda_gan, log

        if mode == 'd':
            fake = jax.lax.stop_gradient(disc_in_fake)   # mirrors .detach().clone()
            disc_loss, r1, mean_r, mean_f = self._d_fn(
                disc_in_real, fake, self.w1_bf16, self.b1,
                self.w2_row, self.b2)
            if self.cfg.lambda_grad > 0:
                grad_penalty = r1
            else:
                grad_penalty = jnp.float32(0.0)
            d_loss = (disc_loss * self.cfg.lambda_gan
                      + grad_penalty * self.cfg.lambda_grad / 2.0)
            log = {
                'loss_train/disc_loss': disc_loss,
                'loss_train/r1_loss': grad_penalty,
                'loss_train/logits_real': mean_r,
                'loss_train/logits_fake': mean_f,
            }
            return d_loss, log

        raise ValueError(f"unknown mode {mode}")

    __call__ = forward


# ----------------------------------------------------------------------------
# pure-JAX reference (for correctness check of the fused kernels)
# ----------------------------------------------------------------------------

def _reference(img_real, img_fake, w1_bf, b1, w2_row, b2, kind):
    def disc(img):
        bsz = img.shape[0]
        x = img.reshape(bsz, -1).astype(jnp.float32).astype(jnp.bfloat16)
        w1 = w1_bf[:x.shape[1]]
        h = jnp.dot(x, w1, preferred_element_type=jnp.float32) + b1
        a = jnp.where(h > 0, h, 0.2 * h)
        logits = jnp.sum(a * w2_row, axis=-1, keepdims=True) + b2[0]
        return logits, h, w1

    lr, hr, w1r = disc(img_real)
    lf, _, _ = disc(img_fake)
    if kind == 'logistic':
        g = jnp.mean(_softplus(-lf))
        d = jnp.mean(_softplus(lf)) + jnp.mean(_softplus(-lr))
    else:
        g = -jnp.mean(lf)
        d = (jnp.mean(jnp.maximum(1.0 + lf, 0.0))
             + jnp.mean(jnp.maximum(1.0 - lr, 0.0)))
    dact = jnp.where(hr > 0, 1.0, 0.2)
    g_hidden = dact * w2_row
    grad_x = jnp.dot(g_hidden, w1r.astype(jnp.float32).T)
    r1 = jnp.mean(jnp.sum(grad_x * grad_x, axis=1))
    return g, d, r1, jnp.mean(lr), jnp.mean(lf)


# ----------------------------------------------------------------------------
# Demo
# ----------------------------------------------------------------------------

if __name__ == "__main__":
    B, C, H, W = 2, 3, 16, 16
    key = jax.random.PRNGKey(0)
    k_real, k_fake = jax.random.split(key)
    disc_in_real = jax.random.normal(k_real, (B, C, H, W), jnp.float32)
    disc_in_fake = jax.random.normal(k_fake, (B, C, H, W), jnp.float32)

    cfg = Config(lambda_gan=1.0, lambda_grad=10.0)

    results = []
    for kind in ('logistic', 'hinge'):
        gan_loss = GANLoss(cfg, disc_loss=kind, auxillary=False,
                           in_channels=C, hidden=128, img_hw=H)
        g_loss, g_log = gan_loss(disc_in_real, disc_in_fake, mode='g')
        d_loss, d_log = gan_loss(disc_in_real, disc_in_fake, mode='d')
        results.extend([g_loss, d_loss])

        # correctness check against pure-JAX reference
        rg, rd, rr1, rmr, rmf = _reference(
            disc_in_real, disc_in_fake, gan_loss.w1_bf16, gan_loss.b1,
            gan_loss.w2_row, gan_loss.b2, kind)
        assert jnp.allclose(g_log['loss_train/g_loss'], rg,
                            rtol=2e-2, atol=2e-2)
        assert jnp.allclose(d_log['loss_train/disc_loss'], rd,
                            rtol=2e-2, atol=2e-2)
        assert jnp.allclose(d_log['loss_train/r1_loss'], rr1,
                            rtol=2e-2, atol=2e-2)
        assert jnp.allclose(d_log['loss_train/logits_real'], rmr,
                            rtol=2e-2, atol=2e-2)
        assert jnp.allclose(d_log['loss_train/logits_fake'], rmf,
                            rtol=2e-2, atol=2e-2)
        ref_d_loss = rd * cfg.lambda_gan + rr1 * cfg.lambda_grad / 2.0
        assert jnp.allclose(d_loss, ref_d_loss, rtol=2e-2, atol=2e-2)

    jax.block_until_ready(results)
    print("KERNEL_OK")
</pallas_src>

<mosaic_0001>
module attributes {stable_mosaic.version = 11 : i64} {
  func.func @_g_fused_kernel(%arg0: i32, %arg1: memref<16x256xbf16, #tpu.memory_space<vmem>>, %arg2: memref<256x128xbf16, #tpu.memory_space<vmem>>, %arg3: memref<1x128xf32, #tpu.memory_space<vmem>>, %arg4: memref<1x128xf32, #tpu.memory_space<vmem>>, %arg5: memref<1xf32, #tpu.memory_space<smem>>, %arg6: memref<1xf32, #tpu.memory_space<smem>>, %arg7: memref<16x128xf32, #tpu.memory_space<vmem>>) attributes {dimension_semantics = [#tpu.dimension_semantics<arbitrary>], iteration_bounds = array<i64: 3>, scalar_prefetch = 0 : i64, scratch_operands = 1 : i64, tpu.core_type = #tpu.core_type<tc>, window_params = [{transform_indices = @transform_0, window_bounds = array<i64: 16, 256>}, {transform_indices = @transform_1, window_bounds = array<i64: 256, 128>}, {pipeline_mode = #tpu.pipeline_mode<synchronous>, transform_indices = @transform_2, window_bounds = array<i64: 1, 128>}, {pipeline_mode = #tpu.pipeline_mode<synchronous>, transform_indices = @transform_3, window_bounds = array<i64: 1, 128>}, {transform_indices = @transform_4, window_bounds = array<i64: 1>}, {transform_indices = @transform_5, window_bounds = array<i64: 1>}]} {
    %c0_i32 = arith.constant 0 : i32
    %0 = arith.cmpi eq, %arg0, %c0_i32 : i32
    %1 = arith.extui %0 : i1 to i32
    %c0_i32_0 = arith.constant 0 : i32
    %2 = arith.cmpi ne, %1, %c0_i32_0 : i32
    scf.if %2 {
      %cst_9 = arith.constant 0.000000e+00 : f32
      %12 = vector.broadcast %cst_9 : f32 to vector<16x128xf32>
      %c0_10 = arith.constant 0 : index
      %c0_11 = arith.constant 0 : index
      %13 = vector.load %arg7[%c0_10, %c0_11] : memref<16x128xf32, #tpu.memory_space<vmem>>, vector<16x128xf32>
      tpu.vector_store %arg7[%c0_10, %c0_11], %12 {strides = array<i32>} : memref<16x128xf32, #tpu.memory_space<vmem>>, vector<16x128xf32>,
    } else {
    }
    %c0 = arith.constant 0 : index
    %c0_1 = arith.constant 0 : index
    %3 = vector.load %arg7[%c0, %c0_1] : memref<16x128xf32, #tpu.memory_space<vmem>>, vector<16x128xf32>
    %c0_2 = arith.constant 0 : index
    %c0_3 = arith.constant 0 : index
    %4 = vector.load %arg1[%c0_2, %c0_3] : memref<16x256xbf16, #tpu.memory_space<vmem>>, vector<16x256xbf16>
    %c0_4 = arith.constant 0 : index
    %c0_5 = arith.constant 0 : index
    %5 = vector.load %arg2[%c0_4, %c0_5] : memref<256x128xbf16, #tpu.memory_space<vmem>>, vector<256x128xbf16>
    %cst = arith.constant dense<0.000000e+00> : vector<16x128xf32>
    %6 = tpu.matmul %4, %5, %cst {dimension_numbers = #tpu.dot_dimension_numbers<[1], [0], [0], [1], [0, 0, 1, 1], [], []>} : vector<16x256xbf16>, vector<256x128xbf16>, vector<16x128xf32> -> vector<16x128xf32>
    %7 = arith.addf %3, %6 : vector<16x128xf32>
    %c0_6 = arith.constant 0 : index
    %c0_7 = arith.constant 0 : index
    %8 = vector.load %arg7[%c0_6, %c0_7] : memref<16x128xf32, #tpu.memory_space<vmem>>, vector<16x128xf32>
    tpu.vector_store %arg7[%c0_6, %c0_7], %7 {strides = array<i32>} : memref<16x128xf32, #tpu.memory_space<vmem>>, vector<16x128xf32>,
    %c2_i32 = arith.constant 2 : i32
    %9 = arith.cmpi eq, %arg0, %c2_i32 : i32
    %10 = arith.extui %9 : i1 to i32
    %c0_i32_8 = arith.constant 0 : i32
    %11 = arith.cmpi ne, %10, %c0_i32_8 : i32
    scf.if %11 {
      %c0_9 = arith.constant 0 : index
      %c0_10 = arith.constant 0 : index
      %12 = vector.load %arg7[%c0_9, %c0_10] : memref<16x128xf32, #tpu.memory_space<vmem>>, vector<16x128xf32>
      %c0_11 = arith.constant 0 : index
      %c0_12 = arith.constant 0 : index
      %13 = vector.load %arg3[%c0_11, %c0_12] : memref<1x128xf32, #tpu.memory_space<vmem>>, vector<1x128xf32>
      %14 = vector.broadcast %13 : vector<1x128xf32> to vector<16x128xf32>
      %15 = arith.addf %12, %14 : vector<16x128xf32>
      %cst_13 = arith.constant 0.000000e+00 : f32
      %16 = vector.broadcast %cst_13 : f32 to vector<16x128xf32>
      %17 = arith.cmpf ogt, %15, %16 : vector<16x128xf32>
      %cst_14 = arith.constant 2.000000e-01 : f32
      %18 = vector.broadcast %cst_14 : f32 to vector<16x128xf32>
      %19 = arith.mulf %18, %15 : vector<16x128xf32>
      %20 = arith.select %17, %15, %19 : vector<16x128xi1>, vector<16x128xf32>
      %c0_15 = arith.constant 0 : index
      %c0_16 = arith.constant 0 : index
      %21 = vector.load %arg4[%c0_15, %c0_16] : memref<1x128xf32, #tpu.memory_space<vmem>>, vector<1x128xf32>
      %22 = vector.broadcast %21 : vector<1x128xf32> to vector<16x128xf32>
      %23 = arith.mulf %20, %22 : vector<16x128xf32>
      %cst_17 = arith.constant dense<0.000000e+00> : vector<16xf32>
      %24 = vector.multi_reduction <add>, %23, %cst_17 [1] : vector<16x128xf32> to vector<16xf32>
      %25 = vector.shape_cast %24 : vector<16xf32> to vector<16x1xf32>
      %c0_18 = arith.constant 0 : index
      %26 = memref.load %arg5[%c0_18] : memref<1xf32, #tpu.memory_space<smem>>
      %27 = vector.broadcast %26 : f32 to vector<16x1xf32>
      %28 = arith.addf %25, %27 : vector<16x1xf32>
      %29 = tpu.iota {dimensions = array<i32: 0>} : vector<16x1xi32>
      %c2_i32_19 = arith.constant 2 : i32
      %30 = vector.broadcast %c2_i32_19 : i32 to vector<16x1xi32>
      %31 = arith.cmpi slt, %29, %30 : vector<16x1xi32>
      %cst_20 = arith.constant 0.000000e+00 : f32
      %32 = vector.broadcast %cst_20 : f32 to vector<16x1xf32>
      %33 = arith.subf %32, %28 : vector<16x1xf32>
      %cst_21 = arith.constant 0.000000e+00 : f32
      %34 = vector.broadcast %cst_21 : f32 to vector<16x1xf32>
      %35 = arith.maximumf %33, %34 : vector<16x1xf32>
      %36 = math.absf %33 : vector<16x1xf32>
      %cst_22 = arith.constant 0.000000e+00 : f32
      %37 = vector.broadcast %cst_22 : f32 to vector<16x1xf32>
      %38 = arith.subf %37, %36 : vector<16x1xf32>
      %39 = math.exp %38 : vector<16x1xf32>
      %cst_23 = arith.constant 1.000000e+00 : f32
      %40 = vector.broadcast %cst_23 : f32 to vector<16x1xf32>
      %41 = arith.addf %40, %39 : vector<16x1xf32>
      %42 = math.log %41 : vector<16x1xf32>
      %43 = arith.addf %35, %42 : vector<16x1xf32>
      %cst_24 = arith.constant 0.000000e+00 : f32
      %44 = vector.broadcast %cst_24 : f32 to vector<16x1xf32>
      %45 = arith.select %31, %43, %44 : vector<16x1xi1>, vector<16x1xf32>
      %46 = vector.shape_cast %45 : vector<16x1xf32> to vector<1x16x1xf32>
      %cst_25 = arith.constant dense<0.000000e+00> : vector<1xf32>
      %47 = vector.multi_reduction <add>, %46, %cst_25 [1, 2] : vector<1x16x1xf32> to vector<1xf32>
      %48 = vector.shape_cast %47 : vector<1xf32> to vector<1x1x1xf32>
      %49 = vector.extract %48[0, 0, 0] : f32 from vector<1x1x1xf32>
      %cst_26 = arith.constant 5.000000e-01 : f32
      %50 = arith.mulf %49, %cst_26 : f32
      %c0_27 = arith.constant 0 : index
      %51 = memref.load %arg6[%c0_27] : memref<1xf32, #tpu.memory_space<smem>>
      memref.store %50, %arg6[%c0_27] : memref<1xf32, #tpu.memory_space<smem>>
    } else {
    }
    return
  }
  func.func @transform_0(%arg0: i32) -> (i32, i32) {
    %c0_i32 = arith.constant 0 : i32
    %c0_i32_0 = arith.constant 0 : i32
    return %c0_i32, %arg0 : i32, i32
  }
  func.func @transform_1(%arg0: i32) -> (i32, i32) {
    %c0_i32 = arith.constant 0 : i32
    %c0_i32_0 = arith.constant 0 : i32
    return %arg0, %c0_i32 : i32, i32
  }
  func.func @transform_2(%arg0: i32) -> (i32, i32) {
    %c0_i32 = arith.constant 0 : i32
    %c0_i32_0 = arith.constant 0 : i32
    %c0_i32_1 = arith.constant 0 : i32
    return %c0_i32, %c0_i32_0 : i32, i32
  }
  func.func @transform_3(%arg0: i32) -> (i32, i32) {
    %c0_i32 = arith.constant 0 : i32
    %c0_i32_0 = arith.constant 0 : i32
    %c0_i32_1 = arith.constant 0 : i32
    return %c0_i32, %c0_i32_0 : i32, i32
  }
  func.func @transform_4(%arg0: i32) -> i32 {
    %c0_i32 = arith.constant 0 : i32
    %c0_i32_0 = arith.constant 0 : i32
    return %c0_i32 : i32
  }
  func.func @transform_5(%arg0: i32) -> i32 {
    %c0_i32 = arith.constant 0 : i32
    %c0_i32_0 = arith.constant 0 : i32
    return %c0_i32 : i32
  }
}

</mosaic_0001>

<bundles_post_ra>
// kernel: _gan_forward_g.1
= control target key start
LH: loop header
LB: loop body
LE: loop exit
PB: predicated region body
PF: predicated region fallthrough
CT: control target
= control target key end

     0   :  { %s1030_s0 = inlined_call_operand.vmem [shape: bf16[16,768], index: 0, kind: input, shape index: {}]   ;;  %s1031_s1 = inlined_call_operand.hbm [shape: bf16[768,128], index: 1, kind: input, shape index: {}]   ;;  %s1032_s2 = inlined_call_operand.vmem [shape: f32[1,128], index: 2, kind: input, shape index: {}]   ;;  %s1033_s3 = inlined_call_operand.vmem [shape: f32[1,128], index: 3, kind: input, shape index: {}]   ;;  %s1034_s4 = inlined_call_operand.<no memory space> [shape: f32[1], index: 4, kind: input, shape index: {}]   ;;  %s1035_s5 = inlined_call_operand.hbm [shape: f32[1], index: 5, kind: output, shape index: {}]  }
   0x1   :  { %10 = sst [smem:[#allocation3]] %s1034_s4 }
   0x2   :  { %11 = vsyncpa [#allocation6], 0 }
   0x3   :  { %13 = vsyncpa [#allocation6 + $0x1], 0 }
   0x4   :  { %14 = vsyncpa [#allocation7], 0  ;;  %s908_s20 = smov 0   ;;  %s910_s21 = smov 0  }
   0x5   :  { %s912_s22 = smov 0   ;;  %s914_s23 = smov 0  }
   0x6 LB: > { %s927_s4 = sadd.s32 4294967295, %s869_s23   ;;  %s930_s24 = sadd.s32 1, %s869_s23   ;;  %s869_s23 = sphi %s914_s23, %s1041_s23   ;;  %s865_s22 = sphi %s912_s22, %s1040_s22   ;;  %s861_s21 = sphi %s910_s21, %s1039_s21   ;;  %s857_s20 = sphi %s908_s20, %s1038_s20  }
   0x7   : > { %s24_s25 = ssub.s32 %s869_s23, %s930_s24  ;;  %s27_s26 = sadd.s32 1, %s865_s22 }
   0x8   : > { %p25_p0 = scmp.eq.s32.totalorder %s24_s25, 0  ;;  %p34_p1 = scmp.ne.s32.totalorder %s865_s22, %s861_s21 }
   0x9   : > { %p35_p2 = scmp.eq.s32.totalorder %s869_s23, 0  ;;  %p66_p3 = scmp.ne.s32.totalorder %s861_s21, %s857_s20 }
   0xa   : > { %s940_s27 = scalar_select %p25_p0, %s865_s22, %s27_s26  }
   0xb   : > { %p942_p4 = por %p35_p2, %p34_p1  ;;  %p67_p5 = scmp.eq.s32.totalorder %s927_s4, 0 }
   0xc   : > { %p629_p7 = scmp.ge.s32.totalorder %s869_s23, 3 }
   0xd   : > { %p947_p6 = por %p67_p5, %p66_p3 }
   0xe   : > { %179 = sbr.rel (%p629_p7) target bundleno = 42 (0x2a), region = 28 }
  0x13   : > { %182 = sbr.rel (!%p942_p4) target bundleno = 25 (0x19), region = 32  ;;  %s184_s30 = sand.u32 (%p942_p4), 1, %s865_s22  }
  0x14   : > { %s717_s6 = sshll.u32 (%p942_p4), %s869_s23, 3  ;;  %s630_s7 = sshll.u32 (%p942_p4), %s184_s30, 4 }
  0x15   : > { %s189_s10 = scalar_lea.vmem (%p942_p4), %s1030_s0, %s717_s6  ;;  %s186_s11 = scalar_lea.vmem (%p942_p4), [#allocation4], %s630_s7 }
  0x16   : > { %v220_v0 = vld [vmem:[%s189_s10] sm:$0xff] (%p942_p4)  ;;  %v222_v1 = vld [vmem:[%s189_s10 + $0x18] sm:$0xff] (%p942_p4) }
  0x17   : > { %221 = vst [vmem:[%s186_s11] sm:$0xff] (%p942_p4), %v220_v0 }
  0x18   : > { %223 = vst [vmem:[%s186_s11 + $0x8] sm:$0xff] %v222_v1 }
  0x19 PF: > { %s230_s12 = sand.u32 1, %s865_s22   ;;  %s718_s13 = sshll.u32 %s869_s23, 7 }
  0x1a   : > { %s633_s14 = sshll.u32 %s230_s12, 7  ;;  %s239_s17 = scalar_lea.hbm %s1031_s1, %s718_s13 }
  0x1b   : > { %s240_s18 = sshll.u32 %s239_s17, 4  ;;  %s234_s19 = scalar_lea.vmem [#allocation5], %s633_s14  ;;  %s241_s18 = int_to_ptr.hbm [resolvable:$true] %s240_s18 }
  0x1c   : > { %s242_s20 = sshll.u32 %s234_s19, 4  ;;  %s231_s25 = scalar_lea.sflag [#allocation6], %s230_s12  ;;  %s243_s20 = int_to_ptr.vmem [resolvable:$true] %s242_s20 }
  0x1d   : > { %s789_s26 = sshra.s32 %s241_s18, 4  ;;  %s795_s8 = scalar_lea.hbm %s1031_s1, 384  ;;  %s790_s26 = int_to_ptr.hbm [resolvable:$true] %s789_s26 }
  0x1e   : > { %s791_s30 = scalar_lea.hbm %s790_s26, 128  ;;  %p796_p11 = scmp.lt.s32.totalorder %s790_s26, %s1031_s1 }
  0x1f   : > { %p792_p8 = scmp.ne.s32.totalorder %s790_s26, %s791_s30  ;;  %p797_p12 = scmp.lt.s32.totalorder %s795_s8, %s791_s30 }
  0x21   : > { %p793_p9 = pnand %p792_p8, %p942_p4  ;;  %p798_p13 = por %p797_p12, %p796_p11 }
  0x23   : > { %p794_p10 = pneg %p793_p9 }
  0x25   : > { %p799_p0 = pnand %p798_p13, %p794_p10 }
  0x27   : > { %802 = shalt.err (!%p799_p0)
}
  0x28   : > { %s871_s11 = smov 64   ;;  %s872_s12 = smov 4  }
  0x29   : > { %739 = dma.hbm_to_vmem [thread:$0]  (%p942_p4), %s241_s18, 2048, %s243_s20, %s231_s25, %s871_s11, %s871_s11, %s872_s12  }
  0x2a PF: > { %p636_p1 = scmp.ge.s32.totalorder %s869_s23, 1  ;;  %p250_p2 = scmp.lt.s32.totalorder %s869_s23, 4 }
  0x2c   : > { %p251_p3 = pnand %p636_p1, %p250_p2 }
  0x2d   : > { %s257_s13 = sand.u32 (!%p251_p3), 1, %s861_s21  }
  0x2e   : > { %254 = sbr.rel (%p251_p3) target bundleno = 578 (0x242), region = 74  ;;  %s637_s14 = sshll.u32 (!%p251_p3), %s257_s13, 4 }
  0x2f   : > { %s638_s15 = sshll.u32 (!%p251_p3), %s257_s13, 7  ;;  %s977_s16 = scalar_lea.vmem (!%p251_p3), [#allocation4], %s637_s14 }
  0x30   : > { %s264_s17 = scalar_lea.sflag (!%p251_p3), [#allocation6], %s257_s13  ;;  %s979_s19 = scalar_lea.vmem (!%p251_p3), [#allocation5], %s638_s15 }
  0x33   : > { %848 = dma.done.wait (%p947_p6), %s264_s17, 2048  }
  0x34   : > { %850 = vsyncadd (%p947_p6), %s264_s17, 4294965248  ;;  %p639_p4 = scmp.ne.s32.totalorder %s927_s4, 0 }
  0x36   : > { %299 = sbr.rel (%p639_p4) target bundleno = 62 (0x3e), region = 86 }
  0x3b   : > { %v873_v2 = vmov 0.0  }
  0x3c   : > { %300 = vst [vmem:[#allocation2] sm:$0xff] %v873_v2 }
  0x3d   : > { %301 = vst [vmem:[#allocation2 + $0x8] sm:$0xff] %v873_v2 }
  0x3e PF: > { %v728_v3 = vld [vmem:[%s979_s19 + $0x38] sm:$0xff]  ;;  %v727_v5 = vld [vmem:[%s979_s19 + $0x30] sm:$0xff]  ;;  %v726_v7 = vld [vmem:[%s979_s19 + $0x28] sm:$0xff]  ;;  %p712_p5 = scmp.ne.s32.totalorder %s927_s4, 2 }
  0x3f   : > { %v736_v4 = vld [vmem:[%s979_s19 + $0x78] sm:$0xff]  ;;  %444 = vmatpush.bf16.msra.mxu0 %v728_v3  ;;  %v735_v6 = vld [vmem:[%s979_s19 + $0x70] sm:$0xff]  ;;  %v734_v8 = vld [vmem:[%s979_s19 + $0x68] sm:$0xff]  ;;  %s504_s20 = sld [smem:[#allocation3]] (!%p712_p5) }
  0x40   : > { %458 = vmatpush.bf16.msra.mxu1 %v736_v4  ;;  %v725_v9 = vld [vmem:[%s979_s19 + $0x20] sm:$0xff]  ;;  %v724_v11 = vld [vmem:[%s979_s19 + $0x18] sm:$0xff]  ;;  %v723_v13 = vld [vmem:[%s979_s19 + $0x10] sm:$0xff] }
  0x41   : > { %v733_v10 = vld [vmem:[%s979_s19 + $0x60] sm:$0xff]  ;;  %v732_v12 = vld [vmem:[%s979_s19 + $0x58] sm:$0xff]  ;;  %v731_v14 = vld [vmem:[%s979_s19 + $0x50] sm:$0xff] }
  0x42   : > { %v722_v15 = vld [vmem:[%s979_s19 + $0x8] sm:$0xff]  ;;  %v721_v17 = vld [vmem:[%s979_s19] sm:$0xff] }
  0x43   : > { %445 = vmatpush.bf16.msra.mxu0 %v727_v5  ;;  %v730_v16 = vld [vmem:[%s979_s19 + $0x48] sm:$0xff]  ;;  %v729_v18 = vld [vmem:[%s979_s19 + $0x40] sm:$0xff]  ;;  %v302_v26 = vld [vmem:[#allocation2] sm:$0xff] }
  0x44   : > { %459 = vmatpush.bf16.msra.mxu1 %v735_v6  ;;  %v642_v19 = vld [vmem:[%s977_s16] sm:$0xf]  ;;  %v720_v20 = vld [vmem:[%s977_s16 + $0x4] sm:$0xf0]  ;;  %v719_v21 = vld [vmem:[%s977_s16 + $0x4] sm:$0xf] }
  0x45   : > { %v644_v22 = vld [vmem:[%s977_s16 + $0x8] sm:$0xf0]  ;;  %v643_v23 = vor.u32 %v720_v20, %v642_v19 }
  0x46   : > { %v647_v24 = vor.u32 %v719_v21, %v644_v22  ;;  %v303_v31 = vld [vmem:[#allocation2 + $0x8] sm:$0xff] }
  0x47   : > { %446 = vmatpush.bf16.msra.mxu0 %v726_v7 }
  0x48   : > { %460 = vmatpush.bf16.msra.mxu1 %v734_v8 }
  0x4b   : > { %447 = vmatpush.bf16.msra.mxu0 %v725_v9 }
  0x4c   : > { %461 = vmatpush.bf16.msra.mxu1 %v733_v10 }
  0x4f   : > { %448 = vmatpush.bf16.msra.mxu0 %v724_v11 }
  0x50   : > { %462 = vmatpush.bf16.msra.mxu1 %v732_v12 }
  0x53   : > { %449 = vmatpush.bf16.msra.mxu0 %v723_v13 }
  0x54   : > { %463 = vmatpush.bf16.msra.mxu1 %v731_v14 }
  0x57   : > { %450 = vmatpush.bf16.msra.mxu0 %v722_v15 }
  0x58   : > { %464 = vmatpush.bf16.msra.mxu1 %v730_v16 }
  0x5b   : > { %451 = vmatpush.bf16.msra.mxu0 %v721_v17 }
  0x5c   : > { %465 = vmatpush.bf16.msra.mxu1 %v729_v18 }
  0x5e   : > { %452 = vmatmul.bf16.vlgmr.msra.gmra.mxu0 %v643_v23 }
  0x5f   : > { %466 = vmatmul.bf16.vlgmr.msra.gmra.mxu1 %v647_v24 }
  0xdb   : > { %v453_v25 = vpop.f32.mrf.mxu0 }
  0xdc   : > { %v467_v27 = vpop.f32.mrf.mxu1 }
  0xdd   : > { %v468_v28 = vadd.f32 %v467_v27, %v453_v25 }
  0xdf   : > { %v472_v29 = vadd.f32 %v468_v28, %v302_v26 }
  0xe1   : > { %474 = vst [vmem:[#allocation2] sm:$0xff] %v472_v29 }
  0xe3   : > { %v455_v30 = vpop.f32.mrf.mxu0 }
  0xe4   : > { %v469_v32 = vpop.f32.mrf.mxu1 }
  0xe5   : > { %v470_v33 = vadd.f32 %v469_v32, %v455_v30  ;;  %479 = sbr.rel (%p712_p5) target bundleno = 572 (0x23c), region = 90 }
  0xe7   : > { %v473_v34 = vadd.f32 %v470_v33, %v303_v31 }
  0xe9   : > { %475 = vst [vmem:[#allocation2 + $0x8] sm:$0xff] %v473_v34 }
  0xea   : > { %v480_v35 = vld [vmem:[#allocation2] sm:$0xff]  ;;  %v505_v42 = vstv %s504_s20  ;;  %v508_v51 = vlaneseq  ;;  %vm535_vm2 = vcmask 7168  }
  0xeb   : > { %v783_v36 = vld [vmem:[%s1032_s2] ss:$0 sm:$0xff] }
  0xec   : > { %v486_v37 = vadd.f32 %v783_v36, %v480_v35  ;;  %v784_v38 = vld [vmem:[%s1033_s3] ss:$0 sm:$0xff]  ;;  %v509_v52 = vshrl.u32 %v508_v51, 7 }
  0xee   : > { %vm488_vm0 = vcmp.gt.f32.partialorder %v486_v37, 0.0  ;;  %v490_v39 = vmul.f32 0.2, %v486_v37  ;;  %vm511_vm1 = vcmp.lt.s32.totalorder %v509_v52, 2 }
  0xf0   : > { %v492_v40 = vsel %vm488_vm0, %v486_v37, %v490_v39 }
  0xf1   : > { %v498_v41 = vmul.f32 %v784_v38, %v492_v40 }
  0xf3   : > { %500 = vadd.xlane.f32.xlu0 %v498_v41 }
 0x166   : > { %v501_v43 = vpop.xlane.xlu0 %500 }
 0x167   : > { %v506_v44 = vadd.f32 %v505_v42, %v501_v43 }
 0x169   : > { %v513_v45 = vsub.f32 0.0, %v506_v44 }
 0x16b   : > { %v517_v46 = vand.u32 2147483647, %v513_v45  ;;  %v515_v54 = vmax.f32 %v513_v45, 0.0 }
 0x16d   : > { %v519_v47 = vsub.f32 0.0, %v517_v46 }
 0x16f   : > { %v521_v48 = vmul.f32 1.442695, %v519_v47 }
 0x171   : > { %785 = vpow2.f32 %v521_v48 }
 0x177   : > { %v786_v49 = vpop.eup %785 }
 0x178   : > { %v525_v50 = vadd.f32 1.0, %v786_v49 }
 0x17a   : > { %787 = vlog2.f32 %v525_v50 }
 0x180   : > { %v788_v53 = vpop.eup %787 }
 0x181   : > { %v528_v55 = vmul.f32 0.6931472, %v788_v53 }
 0x183   : > { %v531_v56 = vadd.f32 %v528_v55, %v515_v54 }
 0x185   : > { %v533_v57 = vsel %vm511_vm1, %v531_v56, 0.0 }
 0x186   : > { %v536_v58 = vsel %vm535_vm2, %v533_v57, 0.0 }
 0x187   : > { %539 = vadd.xlane.f32.xlu0 %v536_v58 }
 0x1fa   : > { %v540_v59 = vpop.xlane.xlu0 %539 }
 0x1fb   : > { %v541_v60 = vrot.slane %v540_v59, 4 }
 0x1fd   : > { %v542_v61 = vadd.f32 %v541_v60, %v540_v59 }
 0x1ff   : > { %v543_v62 = vrot.slane %v542_v61, 2 }
 0x201   : > { %v544_v63 = vadd.f32 %v543_v62, %v542_v61 }
 0x203   : > { %v545_v0 = vrot.slane %v544_v63, 1 }
 0x205   : > { %v546_v1 = vadd.f32 %v545_v0, %v544_v63 }
 0x207   : > { %737 = vpush %v546_v1 }
 0x238   : > { %s738_s25 = spop %737 }
 0x239   : > { %s548_s26 = smul.f32 0.5, %s738_s25 }
 0x23b   : > { %550 = sst [smem:[#allocation8]] %s548_s26 }
 0x23c PF: > { %p745_p6 = scmp.eq.s32.totalorder %s927_s4, 2  ;;  %s557_s7 = sshll.u32 %s1035_s5, 4  ;;  %s558_s7 = int_to_ptr.hbm [resolvable:$true] %s557_s7 }
 0x23d   : > { %s874_s8 = smov [#allocation8]  }
 0x23e   : > { %742 = dma.smem_to_hbm (%p745_p6), %s874_s8, 16, %s558_s7, [#allocation7]  }
 0x23f   : > { %852 = dma.done.wait (%p745_p6), [#allocation7], 16  }
 0x240   : > { %854 = vsyncadd (%p745_p6), [#allocation7], 4294967280 }
 0x241   : > { %566 = sfence }
 0x242 PF: > { %p17_p7 = scmp.ge.s32.totalorder %s930_s24, 5   ;;  %s1038_s20 = smov %s861_s21 }
 0x243   : > { %s1039_s21 = smov %s865_s22  ;;  %s1040_s22 = smov %s940_s27 }
 0x244   : > { %s1041_s23 = smov %s930_s24  ;;  %19 = sbr.rel (!%p17_p7) target bundleno = 6 (0x6), region = 132 }
 0x249   :  { %572 = vsyncpa [#allocation6], 1 }
 0x24a   :  { %574 = vsyncpa [#allocation6 + $0x1], 1 }
 0x24b   :  { %575 = vsyncpa [#allocation7], 1 }
 0x24c   :  { %577 = vsyncpa [#allocation7 + $0x1], 1 }

</bundles_post_ra>
